<compile_context>
chip_gen: v5e
topology: v5e:2x2
jax: 0.10.0
libtpu: 0.0.40
codegen_flags: <defaults>
</compile_context>

<pallas_src>
import jax
import jax.numpy as jnp
from jax.experimental import pallas as pl
from jax.experimental.pallas import tpu as pltpu


def _sigmoid_mul_kernel(gate_ref, x_ref, o_ref):
    # gate_ref: (1, 1, BNC)  lane-dense gate slice for this row block
    # x_ref:    (BNC, HW)
    # o_ref:    (BNC, HW)
    bnc = x_ref.shape[0]

    # Sigmoid of this block's gates only, in f32 (EUP), lane-dense.
    g_row = jax.nn.sigmoid(gate_ref[0].astype(jnp.float32))          # (1, BNC)

    # Relayout (1, BNC) row -> (BNC, 1) column without a transpose:
    # diagonal-select then reduce across lanes. BNC <= 128, so the temporary
    # is at most (128, 128) f32 = 16 vregs; cost hides under HBM time.
    row = jax.lax.broadcasted_iota(jnp.int32, (bnc, bnc), 0)
    col = jax.lax.broadcasted_iota(jnp.int32, (bnc, bnc), 1)
    g_col = jnp.sum(jnp.where(row == col, g_row, 0.0),
                    axis=1, keepdims=True)                           # (BNC, 1)

    # Broadcast multiply over the lane (spatial) axis, in x's native dtype.
    o_ref[...] = x_ref[...] * g_col.astype(o_ref.dtype)


def _pick_block_rows(nc, max_rows=128):
    """Largest divisor of nc that is a multiple of 8 and <= max_rows."""
    best = None
    d = 8
    while d <= min(nc, max_rows):
        if nc % d == 0:
            best = d
        d += 8
    return best if best is not None else nc   # fallback: one full block


def sigmoid_mul(x259, x255):
    """x259: (N, C, 1, 1) gate, x255: (N, C, H, W). Returns x255 * sigmoid(x259)."""
    n, c, h, w = x255.shape
    assert x259.shape == (n, c, 1, 1), (x259.shape, x255.shape)

    nc, hw = n * c, h * w
    bnc = _pick_block_rows(nc)
    num_blocks = nc // bnc

    x2d = x255.reshape(nc, hw)                 # rows = (n, c), lanes = spatial
    g3d = x259.reshape(num_blocks, 1, bnc)     # lane-dense gate, one row / step

    bytes_accessed = (2 * nc * hw * x255.dtype.itemsize
                      + nc * x259.dtype.itemsize)

    out2d = pl.pallas_call(
        _sigmoid_mul_kernel,
        out_shape=jax.ShapeDtypeStruct((nc, hw), x255.dtype),
        grid_spec=pltpu.PrefetchScalarGridSpec(
            num_scalar_prefetch=0,
            grid=(num_blocks,),
            in_specs=[
                pl.BlockSpec((1, 1, bnc), lambda i: (i, 0, 0)),   # gate slice
                pl.BlockSpec((bnc, hw), lambda i: (i, 0)),        # x row block
            ],
            out_specs=pl.BlockSpec((bnc, hw), lambda i: (i, 0)),
        ),
        compiler_params=pltpu.CompilerParams(
            dimension_semantics=("parallel",),    # shard row blocks across TCs
        ),
        cost_estimate=pl.CostEstimate(
            flops=nc * hw,
            transcendentals=nc,
            bytes_accessed=bytes_accessed,
        ),
    )(g3d, x2d)

    return out2d.reshape(n, c, h, w)


if __name__ == "__main__":
    key = jax.random.PRNGKey(0)

    def _check(x_shape, g_shape, k):
        k1, k2 = jax.random.split(k)
        x = jax.random.normal(k1, x_shape, dtype=jnp.float32)
        g = jax.random.normal(k2, g_shape, dtype=jnp.float32)
        out = sigmoid_mul(g, x)
        jax.block_until_ready(out)
        ref = x * jax.nn.sigmoid(g)
        assert out.shape == ref.shape
        assert jnp.allclose(out, ref, atol=1e-6, rtol=1e-6), float(
            jnp.max(jnp.abs(out - ref)))

    k0, k1 = jax.random.split(key)
    # Module's actual shapes: x255 (1, 960, 14, 14), x259 (1, 960, 1, 1)
    #  -> NC=960, BNC=120, 8 pipelined grid steps.
    _check((1, 960, 14, 14), (1, 960, 1, 1), k0)
    # Small smoke shape (single grid step path).
    _check((2, 4, 16, 16), (2, 4, 1, 1), k1)

    print("KERNEL_OK")
</pallas_src>

<mosaic_0001>
module attributes {stable_mosaic.version = 11 : i64} {
  func.func @_sigmoid_mul_kernel(%arg0: i32, %arg1: memref<1x1x120xf32, #tpu.memory_space<vmem>>, %arg2: memref<120x196xf32, #tpu.memory_space<vmem>>, %arg3: memref<120x196xf32, #tpu.memory_space<vmem>>) attributes {dimension_semantics = [#tpu.dimension_semantics<parallel>], iteration_bounds = array<i64: 8>, scalar_prefetch = 0 : i64, scratch_operands = 0 : i64, tpu.core_type = #tpu.core_type<tc>, window_params = [{transform_indices = @transform_0, window_bounds = array<i64: 1, 1, 120>}, {transform_indices = @transform_1, window_bounds = array<i64: 120, 196>}, {transform_indices = @transform_2, window_bounds = array<i64: 120, 196>}]} {
    %c0 = arith.constant 0 : index
    %c0_0 = arith.constant 0 : index
    %c0_1 = arith.constant 0 : index
    %0 = vector.load %arg1[%c0, %c0_0, %c0_1] : memref<1x1x120xf32, #tpu.memory_space<vmem>>, vector<1x1x120xf32>
    %1 = vector.shape_cast %0 : vector<1x1x120xf32> to vector<1x120xf32>
    %2 = arith.negf %1 : vector<1x120xf32>
    %3 = math.exp %2 : vector<1x120xf32>
    %cst = arith.constant 1.000000e+00 : f32
    %4 = vector.broadcast %cst : f32 to vector<1x120xf32>
    %5 = arith.addf %4, %3 : vector<1x120xf32>
    %6 = arith.divf %4, %5 : vector<1x120xf32>
    %7 = tpu.iota {dimensions = array<i32: 0>} : vector<120x120xi32>
    %8 = tpu.iota {dimensions = array<i32: 1>} : vector<120x120xi32>
    %9 = arith.cmpi eq, %7, %8 : vector<120x120xi32>
    %cst_2 = arith.constant 0.000000e+00 : f32
    %10 = vector.shape_cast %6 : vector<1x120xf32> to vector<1x120xf32>
    %11 = vector.broadcast %10 : vector<1x120xf32> to vector<120x120xf32>
    %12 = vector.broadcast %cst_2 : f32 to vector<120x120xf32>
    %13 = arith.select %9, %11, %12 : vector<120x120xi1>, vector<120x120xf32>
    %cst_3 = arith.constant dense<0.000000e+00> : vector<120xf32>
    %14 = vector.multi_reduction <add>, %13, %cst_3 [1] : vector<120x120xf32> to vector<120xf32>
    %15 = vector.shape_cast %14 : vector<120xf32> to vector<120x1xf32>
    %c0_4 = arith.constant 0 : index
    %c0_5 = arith.constant 0 : index
    %16 = vector.load %arg2[%c0_4, %c0_5] : memref<120x196xf32, #tpu.memory_space<vmem>>, vector<120x196xf32>
    %17 = vector.broadcast %15 : vector<120x1xf32> to vector<120x196xf32>
    %18 = arith.mulf %16, %17 : vector<120x196xf32>
    %c0_6 = arith.constant 0 : index
    %c0_7 = arith.constant 0 : index
    %19 = vector.load %arg3[%c0_6, %c0_7] : memref<120x196xf32, #tpu.memory_space<vmem>>, vector<120x196xf32>
    tpu.vector_store %arg3[%c0_6, %c0_7], %18 {strides = array<i32>} : memref<120x196xf32, #tpu.memory_space<vmem>>, vector<120x196xf32>,
    return
  }
  func.func @transform_0(%arg0: i32) -> (i32, i32, i32) {
    %c0_i32 = arith.constant 0 : i32
    %c0_i32_0 = arith.constant 0 : i32
    %c0_i32_1 = arith.constant 0 : i32
    return %arg0, %c0_i32, %c0_i32_0 : i32, i32, i32
  }
  func.func @transform_1(%arg0: i32) -> (i32, i32) {
    %c0_i32 = arith.constant 0 : i32
    %c0_i32_0 = arith.constant 0 : i32
    return %arg0, %c0_i32 : i32, i32
  }
  func.func @transform_2(%arg0: i32) -> (i32, i32) {
    %c0_i32 = arith.constant 0 : i32
    %c0_i32_0 = arith.constant 0 : i32
    return %arg0, %c0_i32 : i32, i32
  }
}

</mosaic_0001>

<bundles_post_ra>
// kernel: tpu_custom_call.1
= control target key start
LH: loop header
LB: loop body
LE: loop exit
PB: predicated region body
PF: predicated region fallthrough
CT: control target
= control target key end

     0   :  { %s490_s9 = smov 0   ;;  %s643_s0 = inlined_call_operand.vmem [shape: f32[8,1,120], index: 0, kind: input, shape index: {}]   ;;  %s644_s1 = inlined_call_operand.vmem [shape: f32[960,196], index: 1, kind: input, shape index: {}]   ;;  %s645_s2 = inlined_call_operand.vmem [shape: f32[960,196], index: 2, kind: output, shape index: {}]  }
   0x1 LB: > { %s496_s10 = sadd.s32 4294967295, %s473_s9   ;;  %p445_p0 = scmp.ge.s32.totalorder %s473_s9, 1  ;;  %s473_s9 = sphi %s490_s9, %s12_s9  }
   0x2   : > { %p122_p1 = scmp.lt.s32.totalorder %s473_s9, 9 }
   0x4   : > { %p123_p2 = pnand %p445_p0, %p122_p1 }
   0x5   : > { %p149_p3 = scmp.lt.s32.totalorder (!%p123_p2), %s496_s10, 7  ;;  %s152_s15 = smul.u32 (!%p123_p2), 15, %s496_s10 }
   0x6   : > { %126 = sbr.rel (%p123_p2) target bundleno = 203 (0xcb), region = 28 }
   0x7   : > { %p153_p4 = scmp.lt.s32.totalorder (!%p123_p2), %s152_s15, 119 }
   0xb   : > { %s150_s11 = scalar_select %p149_p3, %s496_s10, 7  ;;  %v186_v4 = vlaneseq  ;;  %vm237_vm7 = vcmask 982016  }
   0xc   : > { %s647_s15 = smov (!%p153_p4, %s152_s15), 119 }
   0xd   : > { %s151_s14 = scalar_lea.vmem %s643_s0, %s150_s11  ;;  %v505_v8 = vshrl.u32 %v186_v4, 7  ;;  %v507_v12 = vand.u32 127, %v186_v4  ;;  %s453_s16 = sshll.u32 %s647_s15, 4 }
   0xe   : > { %v166_v0 = vld [vmem:[%s151_s14] sm:$0x1]  ;;  %s558_s19 = scalar_lea.vmem %s644_s1, %s453_s16  ;;  %s567_s22 = scalar_lea.vmem %s645_s2, %s453_s16 }
   0xf   : > { %v450_v1 = vmul.f32 -1.442695, %v166_v0  ;;  %v191_v14 = vadd.s32 32, %v505_v8  ;;  %v189_v15 = vadd.s32 16, %v505_v8  ;;  %vm204_vm4 = vcmp.eq.s32.totalorder %v505_v8, %v507_v12  ;;  %v291_v62 = vld [vmem:[%s558_s19 + $0x40] sm:$0xff]  ;;  %v292_v63 = vld [vmem:[%s558_s19 + $0x48] sm:$0xff] }
  0x10   : > { %v192_v18 = vadd.s32 40, %v505_v8  ;;  %v190_v20 = vadd.s32 24, %v505_v8  ;;  %v188_v22 = vadd.s32 8, %v505_v8  ;;  %v195_v32 = vadd.s32 64, %v505_v8  ;;  %v287_v0 = vld [vmem:[%s558_s19 + $0x20] sm:$0xff] }
  0x11   : > { %463 = vpow2.f32 %v450_v1  ;;  %vm208_vm5 = vcmp.eq.s32.totalorder %v191_v14, %v507_v12  ;;  %vm206_vm6 = vcmp.eq.s32.totalorder %v189_v15, %v507_v12  ;;  %v194_v33 = vadd.s32 56, %v505_v8  ;;  %v288_v1 = vld [vmem:[%s558_s19 + $0x28] sm:$0xff]  ;;  %v283_v4 = vld [vmem:[%s558_s19] sm:$0xff]  ;;  %v294_v14 = vld [vmem:[%s558_s19 + $0x58] sm:$0xff] }
  0x12   : > { %vm209_vm8 = vcmp.eq.s32.totalorder %v192_v18, %v507_v12  ;;  %vm207_vm9 = vcmp.eq.s32.totalorder %v190_v20, %v507_v12  ;;  %vm205_vm10 = vcmp.eq.s32.totalorder %v188_v22, %v507_v12  ;;  %v193_v34 = vadd.s32 48, %v505_v8  ;;  %v289_v15 = vld [vmem:[%s558_s19 + $0x30] sm:$0xff] }
  0x13   : > { %vm212_vm11 = vcmp.eq.s32.totalorder %v195_v32, %v507_v12  ;;  %vm211_vm12 = vcmp.eq.s32.totalorder %v194_v33, %v507_v12  ;;  %v198_v41 = vadd.s32 88, %v505_v8  ;;  %v197_v42 = vadd.s32 80, %v505_v8 }
  0x14   : > { %vm210_vm13 = vcmp.eq.s32.totalorder %v193_v34, %v507_v12  ;;  %v196_v43 = vadd.s32 72, %v505_v8  ;;  %v201_v50 = vadd.s32 112, %v505_v8  ;;  %v200_v51 = vadd.s32 104, %v505_v8  ;;  %v295_v34 = vld [vmem:[%s558_s19 + $0x60] sm:$0xff] }
  0x15   : > { %vm215_vm14 = vcmp.eq.s32.totalorder %v198_v41, %v507_v12  ;;  %vm214_vm15 = vcmp.eq.s32.totalorder %v197_v42, %v507_v12  ;;  %v199_v52 = vadd.s32 96, %v505_v8  ;;  %v284_v8 = vld [vmem:[%s558_s19 + $0x8] sm:$0xff] }
  0x17   : > { %v464_v2 = vpop.eup %463 }
  0x18   : > { %v170_v3 = vadd.f32 1.0, %v464_v2 }
  0x1a   : > { %465 = vrcp.f32 %v170_v3  ;;  %v182_v7 = vand.u32 2147483648, %v170_v3  ;;  %vm176_vm0 = vweird.f32 %v170_v3  ;;  %v180_v10 = vand.u32 2147483647, %v170_v3 }
  0x1c   : > { %v183_v13 = vor.u32 1.1754944e-38, %v182_v7  ;;  %vm181_vm3 = vcmp.eq.f32.partialorder %v180_v10, 8.507059e+37 }
  0x20   : > { %v466_v5 = vpop.eup %465 }
  0x21   : > { %v172_v6 = vmul.f32 %v466_v5, %v170_v3  ;;  %vm177_vm1 = vweird.f32 %v466_v5 }
  0x22   : > { %vm178_vm2 = vmor %vm176_vm0, %vm177_vm1  ;;  %vm213_vm0 = vcmp.eq.s32.totalorder %v196_v43, %v507_v12  ;;  %vm218_vm1 = vcmp.eq.s32.totalorder %v201_v50, %v507_v12  ;;  %v305_v43 = vld [vmem:[%s558_s19 + $0xb0] sm:$0xff] }
  0x23   : > { %v173_v9 = vsub.f32 1.0, %v172_v6 }
  0x25   : > { %v174_v11 = vmul.f32 %v466_v5, %v173_v9 }
  0x27   : > { %v175_v16 = vadd.f32 %v466_v5, %v174_v11 }
  0x29   : > { %v179_v17 = vsel %vm178_vm2, %v466_v5, %v175_v16  ;;  %vm217_vm2 = vcmp.eq.s32.totalorder %v200_v51, %v507_v12  ;;  %v290_v16 = vld [vmem:[%s558_s19 + $0x38] sm:$0xff] }
  0x2a   : > { %v184_v19 = vsel %vm181_vm3, %v183_v13, %v179_v17  ;;  %vm216_vm3 = vcmp.eq.s32.totalorder %v199_v52, %v507_v12  ;;  %v293_v13 = vld [vmem:[%s558_s19 + $0x50] sm:$0xff] }
  0x2b   : > { %v220_v21 = vperm.slane %v184_v19, 0  ;;  %v285_v19 = vld [vmem:[%s558_s19 + $0x10] sm:$0xff] }
  0x2d   : > { %v226_v23 = vsel %vm208_vm5, %v220_v21, 0.0  ;;  %v224_v24 = vsel %vm206_vm6, %v220_v21, 0.0  ;;  %v222_v25 = vsel %vm204_vm4, %v220_v21, 0.0  ;;  %v227_v29 = vsel %vm209_vm8, %v220_v21, 0.0 }
  0x2e   : > { %v250_v26 = vsel %vm237_vm7, %v226_v23, 0.0  ;;  %v244_v27 = vsel %vm237_vm7, %v224_v24, 0.0  ;;  %v238_v28 = vsel %vm237_vm7, %v222_v25, 0.0  ;;  %v225_v30 = vsel %vm207_vm9, %v220_v21, 0.0  ;;  %v286_v23 = vld [vmem:[%s558_s19 + $0x18] sm:$0xff] }
  0x2f   : > { %251 = vadd.xlane.f32.xlu2 %v250_v26  ;;  %245 = vadd.xlane.f32.xlu1 %v244_v27  ;;  %v223_v31 = vsel %vm205_vm10, %v220_v21, 0.0  ;;  %v253_v35 = vsel %vm237_vm7, %v227_v29, 0.0  ;;  %v247_v36 = vsel %vm237_vm7, %v225_v30, 0.0  ;;  %v230_v38 = vsel %vm212_vm11, %v220_v21, 0.0  ;;  %v300_v29 = vld [vmem:[%s558_s19 + $0x88] sm:$0xff]  ;;  %v297_v30 = vld [vmem:[%s558_s19 + $0x70] sm:$0xff] }
  0x30   : > { %239 = vadd.xlane.f32.xlu0 %v238_v28  ;;  %v241_v37 = vsel %vm237_vm7, %v223_v31, 0.0  ;;  %v229_v39 = vsel %vm211_vm12, %v220_v21, 0.0  ;;  %v228_v40 = vsel %vm210_vm13, %v220_v21, 0.0  ;;  %v262_v44 = vsel %vm237_vm7, %v230_v38, 0.0  ;;  %v299_v28 = vld [vmem:[%s558_s19 + $0x80] sm:$0xff]  ;;  %v298_v31 = vld [vmem:[%s558_s19 + $0x78] sm:$0xff] }
  0x31   : > { %v259_v45 = vsel %vm237_vm7, %v229_v39, 0.0  ;;  %v256_v46 = vsel %vm237_vm7, %v228_v40, 0.0  ;;  %v233_v47 = vsel %vm215_vm14, %v220_v21, 0.0  ;;  %v232_v48 = vsel %vm214_vm15, %v220_v21, 0.0  ;;  %v296_v38 = vld [vmem:[%s558_s19 + $0x68] sm:$0xff] }
  0x32   : > { %v231_v49 = vsel %vm213_vm0, %v220_v21, 0.0  ;;  %v271_v53 = vsel %vm237_vm7, %v233_v47, 0.0  ;;  %v268_v54 = vsel %vm237_vm7, %v232_v48, 0.0  ;;  %v236_v56 = vsel %vm218_vm1, %v220_v21, 0.0 }
  0x33   : > { %v265_v55 = vsel %vm237_vm7, %v231_v49, 0.0  ;;  %v235_v57 = vsel %vm217_vm2, %v220_v21, 0.0  ;;  %v234_v58 = vsel %vm216_vm3, %v220_v21, 0.0  ;;  %v280_v59 = vsel %vm237_vm7, %v236_v56, 0.0  ;;  %v301_v49 = vld [vmem:[%s558_s19 + $0x90] sm:$0xff] }
  0x34   : > { %v277_v60 = vsel %vm237_vm7, %v235_v57, 0.0  ;;  %v274_v61 = vsel %vm237_vm7, %v234_v58, 0.0  ;;  %vm344_vm4 = vcmask 556032   ;;  %v311_v58 = vld [vmem:[%s558_s19 + $0xe0] sm:$0xff] }
  0x37   : > { %254 = vadd.xlane.f32.xlu2 %v253_v35  ;;  %248 = vadd.xlane.f32.xlu1 %v247_v36 }
  0x38   : > { %242 = vadd.xlane.f32.xlu0 %v241_v37 }
  0x3f   : > { %263 = vadd.xlane.f32.xlu2 %v262_v44  ;;  %260 = vadd.xlane.f32.xlu1 %v259_v45  ;;  %v306_v44 = vld [vmem:[%s558_s19 + $0xb8] sm:$0xff]  ;;  %v303_v45 = vld [vmem:[%s558_s19 + $0xa0] sm:$0xff] }
  0x40   : > { %257 = vadd.xlane.f32.xlu0 %v256_v46  ;;  %v304_v46 = vld [vmem:[%s558_s19 + $0xa8] sm:$0xff] }
  0x47   : > { %272 = vadd.xlane.f32.xlu2 %v271_v53  ;;  %269 = vadd.xlane.f32.xlu1 %v268_v54  ;;  %v302_v53 = vld [vmem:[%s558_s19 + $0x98] sm:$0xff] }
  0x48   : > { %266 = vadd.xlane.f32.xlu0 %v265_v55 }
  0x4f   : > { %281 = vadd.xlane.f32.xlu2 %v280_v59  ;;  %278 = vadd.xlane.f32.xlu1 %v277_v60  ;;  %v312_v59 = vld [vmem:[%s558_s19 + $0xe8] sm:$0xff]  ;;  %v309_v60 = vld [vmem:[%s558_s19 + $0xd0] sm:$0xff] }
  0x50   : > { %275 = vadd.xlane.f32.xlu0 %v274_v61  ;;  %v310_v61 = vld [vmem:[%s558_s19 + $0xd8] sm:$0xff] }
  0xa2   : > { %v252_v2 = vpop.xlane.xlu2 %251  ;;  %v246_v3 = vpop.xlane.xlu1 %245 }
  0xa3   : > { %v321_v5 = vmul.f32 %v291_v62, %v252_v2  ;;  %v322_v6 = vmul.f32 %v292_v63, %v252_v2  ;;  %v317_v7 = vmul.f32 %v287_v0, %v246_v3  ;;  %v240_v9 = vpop.xlane.xlu0 %239  ;;  %v318_v10 = vmul.f32 %v288_v1, %v246_v3  ;;  %v307_v0 = vld [vmem:[%s558_s19 + $0xc0] sm:$0xff] }
  0xa4   : > { %v313_v11 = vmul.f32 %v283_v4, %v240_v9  ;;  %v314_v12 = vmul.f32 %v284_v8, %v240_v9  ;;  %v308_v4 = vld [vmem:[%s558_s19 + $0xc8] sm:$0xff] }
  0xa5   : > { %352 = vst [vmem:[%s567_s22 + $0x40] sm:$0xff] %v321_v5 }
  0xa6   : > { %353 = vst.msk [vmem:[%s567_s22 + $0x48] sm:$0xff] %vm344_vm4, %v322_v6 }
  0xa7   : > { %348 = vst [vmem:[%s567_s22 + $0x20] sm:$0xff] %v317_v7 }
  0xa8   : > { %349 = vst.msk [vmem:[%s567_s22 + $0x28] sm:$0xff] %vm344_vm4, %v318_v10 }
  0xa9   : > { %343 = vst [vmem:[%s567_s22] sm:$0xff] %v313_v11 }
  0xaa   : > { %345 = vst.msk [vmem:[%s567_s22 + $0x8] sm:$0xff] %vm344_vm4, %v314_v12  ;;  %v255_v17 = vpop.xlane.xlu2 %254  ;;  %v249_v18 = vpop.xlane.xlu1 %248 }
  0xab   : > { %v323_v20 = vmul.f32 %v293_v13, %v255_v17  ;;  %v324_v21 = vmul.f32 %v294_v14, %v255_v17  ;;  %v319_v22 = vmul.f32 %v289_v15, %v249_v18  ;;  %v243_v24 = vpop.xlane.xlu0 %242  ;;  %v320_v25 = vmul.f32 %v290_v16, %v249_v18 }
  0xac   : > { %v315_v26 = vmul.f32 %v285_v19, %v243_v24  ;;  %v316_v27 = vmul.f32 %v286_v23, %v243_v24 }
  0xad   : > { %354 = vst [vmem:[%s567_s22 + $0x50] sm:$0xff] %v323_v20 }
  0xae   : > { %355 = vst.msk [vmem:[%s567_s22 + $0x58] sm:$0xff] %vm344_vm4, %v324_v21 }
  0xaf   : > { %350 = vst [vmem:[%s567_s22 + $0x30] sm:$0xff] %v319_v22 }
  0xb0   : > { %351 = vst.msk [vmem:[%s567_s22 + $0x38] sm:$0xff] %vm344_vm4, %v320_v25 }
  0xb1   : > { %346 = vst [vmem:[%s567_s22 + $0x10] sm:$0xff] %v315_v26 }
  0xb2   : > { %347 = vst.msk [vmem:[%s567_s22 + $0x18] sm:$0xff] %vm344_vm4, %v316_v27  ;;  %v264_v32 = vpop.xlane.xlu2 %263  ;;  %v261_v33 = vpop.xlane.xlu1 %260 }
  0xb3   : > { %v329_v35 = vmul.f32 %v299_v28, %v264_v32  ;;  %v330_v36 = vmul.f32 %v300_v29, %v264_v32  ;;  %v327_v37 = vmul.f32 %v297_v30, %v261_v33  ;;  %v258_v39 = vpop.xlane.xlu0 %257  ;;  %v328_v40 = vmul.f32 %v298_v31, %v261_v33 }
  0xb4   : > { %v325_v41 = vmul.f32 %v295_v34, %v258_v39  ;;  %v326_v42 = vmul.f32 %v296_v38, %v258_v39 }
  0xb5   : > { %360 = vst [vmem:[%s567_s22 + $0x80] sm:$0xff] %v329_v35 }
  0xb6   : > { %361 = vst.msk [vmem:[%s567_s22 + $0x88] sm:$0xff] %vm344_vm4, %v330_v36 }
  0xb7   : > { %358 = vst [vmem:[%s567_s22 + $0x70] sm:$0xff] %v327_v37 }
  0xb8   : > { %359 = vst.msk [vmem:[%s567_s22 + $0x78] sm:$0xff] %vm344_vm4, %v328_v40 }
  0xb9   : > { %356 = vst [vmem:[%s567_s22 + $0x60] sm:$0xff] %v325_v41 }
  0xba   : > { %357 = vst.msk [vmem:[%s567_s22 + $0x68] sm:$0xff] %vm344_vm4, %v326_v42  ;;  %v273_v47 = vpop.xlane.xlu2 %272  ;;  %v270_v48 = vpop.xlane.xlu1 %269 }
  0xbb   : > { %v335_v50 = vmul.f32 %v305_v43, %v273_v47  ;;  %v336_v51 = vmul.f32 %v306_v44, %v273_v47  ;;  %v333_v52 = vmul.f32 %v303_v45, %v270_v48  ;;  %v267_v54 = vpop.xlane.xlu0 %266  ;;  %v334_v55 = vmul.f32 %v304_v46, %v270_v48 }
  0xbc   : > { %v331_v56 = vmul.f32 %v301_v49, %v267_v54  ;;  %v332_v57 = vmul.f32 %v302_v53, %v267_v54 }
  0xbd   : > { %366 = vst [vmem:[%s567_s22 + $0xb0] sm:$0xff] %v335_v50 }
  0xbe   : > { %367 = vst.msk [vmem:[%s567_s22 + $0xb8] sm:$0xff] %vm344_vm4, %v336_v51 }
  0xbf   : > { %364 = vst [vmem:[%s567_s22 + $0xa0] sm:$0xff] %v333_v52 }
  0xc0   : > { %365 = vst.msk [vmem:[%s567_s22 + $0xa8] sm:$0xff] %vm344_vm4, %v334_v55 }
  0xc1   : > { %362 = vst [vmem:[%s567_s22 + $0x90] sm:$0xff] %v331_v56 }
  0xc2   : > { %363 = vst.msk [vmem:[%s567_s22 + $0x98] sm:$0xff] %vm344_vm4, %v332_v57  ;;  %v282_v62 = vpop.xlane.xlu2 %281  ;;  %v279_v63 = vpop.xlane.xlu1 %278 }
  0xc3   : > { %v341_v1 = vmul.f32 %v311_v58, %v282_v62  ;;  %v342_v2 = vmul.f32 %v312_v59, %v282_v62  ;;  %v339_v3 = vmul.f32 %v309_v60, %v279_v63  ;;  %v276_v5 = vpop.xlane.xlu0 %275  ;;  %v340_v6 = vmul.f32 %v310_v61, %v279_v63 }
  0xc4   : > { %v337_v7 = vmul.f32 %v307_v0, %v276_v5  ;;  %v338_v8 = vmul.f32 %v308_v4, %v276_v5 }
  0xc5   : > { %372 = vst [vmem:[%s567_s22 + $0xe0] sm:$0xff] %v341_v1 }
  0xc6   : > { %373 = vst.msk [vmem:[%s567_s22 + $0xe8] sm:$0xff] %vm344_vm4, %v342_v2 }
  0xc7   : > { %370 = vst [vmem:[%s567_s22 + $0xd0] sm:$0xff] %v339_v3 }
  0xc8   : > { %371 = vst.msk [vmem:[%s567_s22 + $0xd8] sm:$0xff] %vm344_vm4, %v340_v6 }
  0xc9   : > { %368 = vst [vmem:[%s567_s22 + $0xc0] sm:$0xff] %v337_v7 }
  0xca   : > { %369 = vst.msk [vmem:[%s567_s22 + $0xc8] sm:$0xff] %vm344_vm4, %v338_v8 }
  0xcb PF: > { %s12_s9 = sadd.s32 1, %s473_s9  }
  0xcc   : > { %p9_p5 = scmp.ge.s32.totalorder %s12_s9, 10  }
  0xce   :  { %11 = sbr.rel (!%p9_p5) target bundleno = 1 (0x1), region = 61 }

</bundles_post_ra>
